<compile_context>
chip_gen: v6e
topology: v6e:2x2x1
jax: 0.10.0
libtpu: 0.0.40
codegen_flags: <defaults>
</compile_context>

<pallas_src>
import jax
import jax.numpy as jnp
from jax import lax
from jax.experimental import pallas as pl
from jax.experimental.pallas import tpu as pltpu


def _round_up(x, m):
    return (x + m - 1) // m * m


def _device_kind():
    try:
        return jax.devices()[0].device_kind.lower()
    except Exception:
        return ""


def _make_single_k_kernel(crelu_split):
    """1-D grid over m-tiles; the whole (padded) K contraction is one dot.

    p_ref:     (TM, K_pad)     bf16 im2col tile
    w_ref:     (K_pad, C_pad)  bf16 weights (constant block index -> resident)
    scale_ref: (1, C_pad)      folded BN scale (f32)
    shift_ref: (1, C_pad)      folded BN shift (f32)
    o_ref:     (TM, C_pad) bf16, or (TM, 2*C_pad) when crelu_split
    """
    def kernel(p_ref, w_ref, scale_ref, shift_ref, o_ref):
        acc = jnp.dot(p_ref[...], w_ref[...],
                      preferred_element_type=jnp.float32)
        y = acc * scale_ref[...] + shift_ref[...]
        if crelu_split:
            c = y.shape[-1]
            o_ref[:, :c] = jnp.maximum(y, 0.0).astype(o_ref.dtype)
            o_ref[:, c:] = jnp.maximum(-y, 0.0).astype(o_ref.dtype)
        else:
            o_ref[...] = jnp.maximum(y, 0.0).astype(o_ref.dtype)
    return kernel


def _make_tiled_k_kernel(crelu_split):
    """2-D grid (m, k): f32 accumulator scratch, finalize at the last k step."""
    def kernel(p_ref, w_ref, scale_ref, shift_ref, o_ref, acc_ref):
        k = pl.program_id(1)

        @pl.when(k == 0)
        def _():
            acc_ref[...] = jnp.zeros_like(acc_ref)

        acc_ref[...] += jnp.dot(p_ref[...], w_ref[...],
                                preferred_element_type=jnp.float32)

        @pl.when(k == pl.num_programs(1) - 1)
        def _():
            y = acc_ref[...] * scale_ref[...] + shift_ref[...]
            if crelu_split:
                c = y.shape[-1]
                o_ref[:, :c] = jnp.maximum(y, 0.0).astype(o_ref.dtype)
                o_ref[:, c:] = jnp.maximum(-y, 0.0).astype(o_ref.dtype)
            else:
                o_ref[...] = jnp.maximum(y, 0.0).astype(o_ref.dtype)
    return kernel


def conv_block_forward(x_nchw, weight_oihw, gamma, beta, running_mean,
                       running_var, *, stride=1, dilation=1, eps=1e-5,
                       concat_before_relu=False, compute_dtype=jnp.bfloat16,
                       tile_m=None, tile_k_target=512, crelu_mode="auto",
                       allow_single_k=True):
    """Forward of ConvBlockBase (bias=False, groups=1, padding=k//2)."""
    N, Cin, H, W = x_nchw.shape
    Cout, Cin_w, KH, KW = weight_oihw.shape
    assert Cin_w == Cin, "groups != 1 not supported"  # TODO(synk): grouped conv

    kind = _device_kind()
    is_v5 = "v5" in kind
    is_v6 = "v6" in kind
    if tile_m is None:
        tile_m = 2048 if is_v6 else 1024          # v7x/v5e keep TM <= 1024

    # PyTorch default padding = kernel_size // 2 (per spatial dim).
    ph, pw = KH // 2, KW // 2
    Ho = (H + 2 * ph - dilation * (KH - 1) - 1) // stride + 1
    Wo = (W + 2 * pw - dilation * (KW - 1) - 1) // stride + 1
    NHW = N * Ho * Wo
    K = Cin * KH * KW

    # CReLU strategy: stack [w, -w] (one lane-dense GEMM) on wide-MXU chips
    # when Cout <= 128; otherwise split the finalize (single GEMM, two stores).
    if concat_before_relu:
        if crelu_mode == "auto":
            stack_crelu = (Cout <= 128) and not is_v5
        else:
            stack_crelu = (crelu_mode == "stack")
    else:
        stack_crelu = False
    crelu_split = concat_before_relu and not stack_crelu

    # ---- glue: weights + folded BatchNorm (inference running stats) -----
    # TODO(synk): training-mode BatchNorm (batch statistics) is not implemented.
    w_mat = jnp.transpose(weight_oihw, (2, 3, 1, 0)).reshape(K, Cout)
    w_mat = w_mat.astype(jnp.float32)
    inv_std = lax.rsqrt(running_var.astype(jnp.float32) + eps)
    scale = gamma.astype(jnp.float32) * inv_std
    shift = beta.astype(jnp.float32) - running_mean.astype(jnp.float32) * scale

    if stack_crelu:
        w_mat = jnp.concatenate([w_mat, -w_mat], axis=1)        # (K, 2*Cout)
        scale = jnp.concatenate([scale, scale])
        shift = jnp.concatenate([shift, -shift])
    C_eff = w_mat.shape[1]                                       # Cout or 2*Cout

    C_pad = _round_up(C_eff, 128)                                # lane-dense
    Cfin_pad = 2 * C_pad if crelu_split else C_pad

    # ---- tile sizes ------------------------------------------------------
    itm = jnp.dtype(compute_dtype).itemsize
    if NHW <= tile_m:
        TM = _round_up(NHW, 256) if NHW >= 256 else _round_up(NHW, 16)
        NHW_pad = TM
    else:
        TM = tile_m
        NHW_pad = _round_up(NHW, TM)

    # K tiling: prefer a single K step (resident weight panel, no accumulator
    # RMW); otherwise pick TK first and pad K up to a multiple of it.
    K_pad128 = _round_up(K, 128)
    single_k = allow_single_k and (
        K_pad128 <= tile_k_target
        or (K_pad128 * C_pad * itm <= 4 * 2**20
            and 2 * TM * K_pad128 * itm <= 16 * 2**20))
    if single_k:
        TK = K_pad = K_pad128
        k_steps = 1
    else:
        TK = tile_k_target
        K_pad = _round_up(K, TK)
        k_steps = K_pad // TK

    # ---- glue: im2col in bf16 (pure data movement) -----------------------
    # TODO(synk): the im2col matrix is still materialized in HBM (KH*KW read
    # amplification); shifted-window BlockSpecs over the padded NHWC tensor
    # would remove that traffic entirely (matters most on v5e).
    x_nhwc = jnp.transpose(x_nchw, (0, 2, 3, 1)).astype(compute_dtype)
    x_padded = jnp.pad(x_nhwc, ((0, 0), (ph, ph), (pw, pw), (0, 0)))
    cols = []
    for kh in range(KH):
        for kw in range(KW):
            h0, w0 = kh * dilation, kw * dilation
            sl = x_padded[:, h0:h0 + (Ho - 1) * stride + 1:stride,
                             w0:w0 + (Wo - 1) * stride + 1:stride, :]
            cols.append(sl.reshape(NHW, Cin))
    patches = jnp.concatenate(cols, axis=-1)                    # (NHW, K) bf16
    patches = jnp.pad(patches, ((0, NHW_pad - NHW), (0, K_pad - K)))

    w_pad = jnp.pad(w_mat, ((0, K_pad - K), (0, C_pad - C_eff)))
    w_pad = w_pad.astype(compute_dtype)
    scale_p = jnp.pad(scale, (0, C_pad - C_eff),
                      constant_values=1.0).reshape(1, C_pad)
    shift_p = jnp.pad(shift, (0, C_pad - C_eff)).reshape(1, C_pad)

    # ---- pallas call ------------------------------------------------------
    m_tiles = NHW_pad // TM
    out_itm = jnp.dtype(compute_dtype).itemsize

    if k_steps == 1:
        grid = (m_tiles,)
        in_specs = [
            pl.BlockSpec((TM, K_pad), lambda m: (m, 0)),        # im2col tile
            pl.BlockSpec((K_pad, C_pad), lambda m: (0, 0)),     # resident weights
            pl.BlockSpec((1, C_pad), lambda m: (0, 0)),         # BN scale
            pl.BlockSpec((1, C_pad), lambda m: (0, 0)),         # BN shift
        ]
        out_spec = pl.BlockSpec((TM, Cfin_pad), lambda m: (m, 0))
        kernel = _make_single_k_kernel(crelu_split)
        scratch = []
        dim_sem = ("parallel",)
        vmem_est = (2 * TM * K_pad * itm + K_pad * C_pad * itm
                    + 2 * TM * Cfin_pad * out_itm + 4 * C_pad * 4)
        w_reads = 1
    else:
        grid = (m_tiles, k_steps)
        in_specs = [
            pl.BlockSpec((TM, TK), lambda m, k: (m, k)),        # im2col tile
            pl.BlockSpec((TK, C_pad), lambda m, k: (k, 0)),     # weight tile
            pl.BlockSpec((1, C_pad), lambda m, k: (0, 0)),      # BN scale
            pl.BlockSpec((1, C_pad), lambda m, k: (0, 0)),      # BN shift
        ]
        out_spec = pl.BlockSpec((TM, Cfin_pad), lambda m, k: (m, 0))
        kernel = _make_tiled_k_kernel(crelu_split)
        scratch = [pltpu.VMEM((TM, C_pad), jnp.float32)]
        dim_sem = ("parallel", "arbitrary")
        vmem_est = (2 * TM * TK * itm + 2 * TK * C_pad * itm
                    + 2 * TM * Cfin_pad * out_itm + TM * C_pad * 4
                    + 4 * C_pad * 4)
        w_reads = m_tiles

    vmem_limit = int(min(40 * 2**20, max(24 * 2**20, 2 * vmem_est)))

    cost = pl.CostEstimate(
        flops=2 * NHW_pad * K_pad * C_pad,
        transcendentals=0,
        bytes_accessed=(NHW_pad * K_pad * itm
                        + w_reads * K_pad * C_pad * itm
                        + NHW_pad * Cfin_pad * out_itm))

    out_flat = pl.pallas_call(
        kernel,
        out_shape=jax.ShapeDtypeStruct((NHW_pad, Cfin_pad), compute_dtype),
        grid_spec=pltpu.PrefetchScalarGridSpec(
            num_scalar_prefetch=0,
            grid=grid,
            in_specs=in_specs,
            out_specs=out_spec,
            scratch_shapes=scratch),
        compiler_params=pltpu.CompilerParams(
            dimension_semantics=dim_sem,
            vmem_limit_bytes=vmem_limit),
        cost_estimate=cost,
    )(patches, w_pad, scale_p, shift_p)

    # ---- glue: strip padding, restore NCHW --------------------------------
    out = out_flat[:NHW]
    if crelu_split:
        out = jnp.concatenate(
            [out[:, :Cout], out[:, C_pad:C_pad + Cout]], axis=-1)
    else:
        out = out[:, :C_eff]
    Cfin = 2 * Cout if concat_before_relu else Cout
    out_nhwc = out.reshape(N, Ho, Wo, Cfin)
    # TODO(synk): keep the whole block NHWC end-to-end if the surrounding model
    # permits; the NCHW<->NHWC transposes are pure layout overhead.
    return jnp.transpose(out_nhwc, (0, 3, 1, 2)).astype(x_nchw.dtype)


def _reference(x, w, gamma, beta, mean, var, *, stride, dilation, eps,
               concat_before_relu, quant_dtype=jnp.bfloat16):
    """Pure-JAX reference.  Conv inputs are quantized to bf16 (matching the
    kernel's compute dtype); the kernel additionally rounds its output to bf16,
    which the test tolerance covers."""
    KH, KW = w.shape[2], w.shape[3]
    xq = x.astype(quant_dtype).astype(jnp.float32)
    wq = w.astype(quant_dtype).astype(jnp.float32)
    y = lax.conv_general_dilated(
        xq, wq, window_strides=(stride, stride),
        padding=((KH // 2, KH // 2), (KW // 2, KW // 2)),
        rhs_dilation=(dilation, dilation),
        dimension_numbers=("NCHW", "OIHW", "NCHW"),
        precision=lax.Precision.HIGHEST)
    y = (y - mean[None, :, None, None]) / jnp.sqrt(
        var[None, :, None, None] + eps) * gamma[None, :, None, None] \
        + beta[None, :, None, None]
    if concat_before_relu:
        y = jnp.concatenate([y, -y], axis=1)
    return jnp.maximum(y, 0.0)


if __name__ == "__main__":
    key = jax.random.PRNGKey(0)
    k_x, k_w, k_g, k_b, k_m, k_v, k_x2, k_w2 = jax.random.split(key, 8)

    N, Cin, Cout, H, W = 2, 4, 8, 16, 16
    KH = KW = 3
    eps = 1e-5

    x = jax.random.normal(k_x, (N, Cin, H, W), jnp.float32)
    weight = jax.random.normal(k_w, (Cout, Cin, KH, KW), jnp.float32) * 0.1
    gamma = 1.0 + 0.1 * jax.random.normal(k_g, (Cout,), jnp.float32)
    beta = 0.1 * jax.random.normal(k_b, (Cout,), jnp.float32)
    running_mean = 0.1 * jax.random.normal(k_m, (Cout,), jnp.float32)
    running_var = jnp.abs(jax.random.normal(k_v, (Cout,), jnp.float32)) + 0.5

    def check(out, ref):
        # tolerance covers bf16 output quantization (~2^-8 relative)
        return bool(jnp.allclose(out.astype(jnp.float32), ref,
                                 rtol=1e-2, atol=1e-2))

    ok = True
    cases = [
        dict(concat_before_relu=False, stride=1, crelu_mode="auto"),
        dict(concat_before_relu=False, stride=2, crelu_mode="auto"),
        dict(concat_before_relu=True, stride=1, crelu_mode="stack"),
        dict(concat_before_relu=True, stride=1, crelu_mode="split"),
    ]
    for cfg in cases:
        out = conv_block_forward(x, weight, gamma, beta, running_mean,
                                 running_var, stride=cfg["stride"],
                                 dilation=1, eps=eps,
                                 concat_before_relu=cfg["concat_before_relu"],
                                 crelu_mode=cfg["crelu_mode"])
        out = jax.block_until_ready(out)
        ref = _reference(x, weight, gamma, beta, running_mean, running_var,
                         stride=cfg["stride"], dilation=1, eps=eps,
                         concat_before_relu=cfg["concat_before_relu"])
        ok &= check(out, ref)

    # Also exercise the tiled-K (2-D grid, accumulator scratch) path.
    Cin2 = 32
    x2 = jax.random.normal(k_x2, (N, Cin2, H, W), jnp.float32)
    w2 = jax.random.normal(k_w2, (Cout, Cin2, KH, KW), jnp.float32) * 0.05
    out = conv_block_forward(x2, w2, gamma, beta, running_mean, running_var,
                             stride=1, dilation=1, eps=eps,
                             concat_before_relu=False,
                             tile_k_target=128, allow_single_k=False)
    out = jax.block_until_ready(out)
    ref = _reference(x2, w2, gamma, beta, running_mean, running_var,
                     stride=1, dilation=1, eps=eps, concat_before_relu=False)
    ok &= check(out, ref)

    print("KERNEL_OK" if ok else "MISMATCH")
</pallas_src>

<mosaic_0001>
module attributes {stable_mosaic.version = 11 : i64} {
  func.func @kernel(%arg0: i32, %arg1: memref<512x128xbf16, #tpu.memory_space<vmem>>, %arg2: memref<128x128xbf16, #tpu.memory_space<vmem>>, %arg3: memref<1x128xf32, #tpu.memory_space<vmem>>, %arg4: memref<1x128xf32, #tpu.memory_space<vmem>>, %arg5: memref<512x128xbf16, #tpu.memory_space<vmem>>) attributes {dimension_semantics = [#tpu.dimension_semantics<parallel>], iteration_bounds = array<i64: 1>, scalar_prefetch = 0 : i64, scratch_operands = 0 : i64, tpu.core_type = #tpu.core_type<tc>, window_params = [{transform_indices = @transform_0, window_bounds = array<i64: 512, 128>}, {pipeline_mode = #tpu.pipeline_mode<synchronous>, transform_indices = @transform_1, window_bounds = array<i64: 128, 128>}, {pipeline_mode = #tpu.pipeline_mode<synchronous>, transform_indices = @transform_2, window_bounds = array<i64: 1, 128>}, {pipeline_mode = #tpu.pipeline_mode<synchronous>, transform_indices = @transform_3, window_bounds = array<i64: 1, 128>}, {transform_indices = @transform_4, window_bounds = array<i64: 512, 128>}]} {
    %c0 = arith.constant 0 : index
    %c0_0 = arith.constant 0 : index
    %0 = vector.load %arg1[%c0, %c0_0] : memref<512x128xbf16, #tpu.memory_space<vmem>>, vector<512x128xbf16>
    %c0_1 = arith.constant 0 : index
    %c0_2 = arith.constant 0 : index
    %1 = vector.load %arg2[%c0_1, %c0_2] : memref<128x128xbf16, #tpu.memory_space<vmem>>, vector<128x128xbf16>
    %cst = arith.constant dense<0.000000e+00> : vector<512x128xf32>
    %2 = tpu.matmul %0, %1, %cst {dimension_numbers = #tpu.dot_dimension_numbers<[1], [0], [0], [1], [0, 0, 1, 1], [], []>} : vector<512x128xbf16>, vector<128x128xbf16>, vector<512x128xf32> -> vector<512x128xf32>
    %c0_3 = arith.constant 0 : index
    %c0_4 = arith.constant 0 : index
    %3 = vector.load %arg3[%c0_3, %c0_4] : memref<1x128xf32, #tpu.memory_space<vmem>>, vector<1x128xf32>
    %4 = vector.broadcast %3 : vector<1x128xf32> to vector<512x128xf32>
    %5 = arith.mulf %2, %4 : vector<512x128xf32>
    %c0_5 = arith.constant 0 : index
    %c0_6 = arith.constant 0 : index
    %6 = vector.load %arg4[%c0_5, %c0_6] : memref<1x128xf32, #tpu.memory_space<vmem>>, vector<1x128xf32>
    %7 = vector.broadcast %6 : vector<1x128xf32> to vector<512x128xf32>
    %8 = arith.addf %5, %7 : vector<512x128xf32>
    %cst_7 = arith.constant 0.000000e+00 : f32
    %9 = vector.broadcast %cst_7 : f32 to vector<512x128xf32>
    %10 = arith.maximumf %8, %9 : vector<512x128xf32>
    %11 = arith.truncf %10 : vector<512x128xf32> to vector<512x128xbf16>
    %c0_8 = arith.constant 0 : index
    %c0_9 = arith.constant 0 : index
    %12 = vector.load %arg5[%c0_8, %c0_9] : memref<512x128xbf16, #tpu.memory_space<vmem>>, vector<512x128xbf16>
    tpu.vector_store %arg5[%c0_8, %c0_9], %11 {strides = array<i32>} : memref<512x128xbf16, #tpu.memory_space<vmem>>, vector<512x128xbf16>,
    return
  }
  func.func @transform_0(%arg0: i32) -> (i32, i32) {
    %c0_i32 = arith.constant 0 : i32
    %c0_i32_0 = arith.constant 0 : i32
    return %arg0, %c0_i32 : i32, i32
  }
  func.func @transform_1(%arg0: i32) -> (i32, i32) {
    %c0_i32 = arith.constant 0 : i32
    %c0_i32_0 = arith.constant 0 : i32
    %c0_i32_1 = arith.constant 0 : i32
    return %c0_i32, %c0_i32_0 : i32, i32
  }
  func.func @transform_2(%arg0: i32) -> (i32, i32) {
    %c0_i32 = arith.constant 0 : i32
    %c0_i32_0 = arith.constant 0 : i32
    %c0_i32_1 = arith.constant 0 : i32
    return %c0_i32, %c0_i32_0 : i32, i32
  }
  func.func @transform_3(%arg0: i32) -> (i32, i32) {
    %c0_i32 = arith.constant 0 : i32
    %c0_i32_0 = arith.constant 0 : i32
    %c0_i32_1 = arith.constant 0 : i32
    return %c0_i32, %c0_i32_0 : i32, i32
  }
  func.func @transform_4(%arg0: i32) -> (i32, i32) {
    %c0_i32 = arith.constant 0 : i32
    %c0_i32_0 = arith.constant 0 : i32
    return %arg0, %c0_i32 : i32, i32
  }
}

</mosaic_0001>

<bundles_post_ra>
// kernel: tpu_custom_call.1
= control target key start
LH: loop header
LB: loop body
LE: loop exit
PB: predicated region body
PF: predicated region fallthrough
CT: control target
= control target key end

     0   :  { %9 = vsyncpa [#allocation3], 0  ;;  %s1994_s0 = inlined_call_operand.hbm [shape: bf16[512,128], index: 0, kind: input, shape index: {}]   ;;  %s1995_s1 = inlined_call_operand.hbm [shape: bf16[128,128], index: 1, kind: input, shape index: {}]   ;;  %s1996_s2 = inlined_call_operand.vmem [shape: f32[1,128], index: 2, kind: input, shape index: {}]   ;;  %s1997_s3 = inlined_call_operand.vmem [shape: f32[1,128], index: 3, kind: input, shape index: {}]   ;;  %s1998_s4 = inlined_call_operand.hbm [shape: bf16[512,128], index: 4, kind: output, shape index: {}]  }
   0x1   :  { %10 = vsyncpa [#allocation6], 0 }
   0x2   :  { %11 = vsyncpa [#allocation4], 0  ;;  %s1808_s15 = smov [#allocation2]  }
   0x3   :  { %s17_s16 = sshll.u32 %s1808_s15, 4  ;;  %s18_s16 = int_to_ptr.vmem [resolvable:$true] %s17_s16 }
   0x4   :  { %s1750_s17 = scalar_lea.vmem %s18_s16, 4096  ;;  %p1755_p1 = scmp.lt.s32.totalorder %s18_s16, %s18_s16 }
   0x5   :  { %p1751_p0 = scmp.ne.s32.totalorder %s18_s16, %s1750_s17  ;;  %p1756_p2 = scmp.lt.s32.totalorder %s1750_s17, %s1750_s17 }
   0x7   :  { %p1757_p3 = por %p1756_p2, %p1755_p1 }
   0x9   :  { %p1758_p4 = pnand %p1757_p3, %p1751_p0 }
   0xb   :  { %1761 = shalt.err (!%p1758_p4)
}
   0xc   :  { %s1809_s18 = smov 64   ;;  %s1810_s19 = smov 4  }
   0xd   :  { %23 = dma.hbm_to_vmem [thread:$0]  %s1994_s0, 4096, %s18_s16, [#allocation3], %s1809_s18, %s1809_s18, %s1810_s19  }
   0xe   :  { %s1811_s22 = smov [#allocation5]  }
   0xf   :  { %s29_s23 = sshll.u32 %s1811_s22, 4  ;;  %s30_s23 = int_to_ptr.vmem [resolvable:$true] %s29_s23 }
  0x10   :  { %s1770_s24 = scalar_lea.vmem %s30_s23, 1024  ;;  %p1775_p6 = scmp.lt.s32.totalorder %s30_s23, %s30_s23 }
  0x11   :  { %p1771_p5 = scmp.ne.s32.totalorder %s30_s23, %s1770_s24  ;;  %p1776_p7 = scmp.lt.s32.totalorder %s1770_s24, %s1770_s24 }
  0x13   :  { %p1777_p8 = por %p1776_p7, %p1775_p6 }
  0x15   :  { %p1778_p9 = pnand %p1777_p8, %p1771_p5 }
  0x17   :  { %1781 = shalt.err (!%p1778_p9)
}
  0x18   :  { %35 = dma.hbm_to_vmem [thread:$0]  %s1995_s1, 1024, %s30_s23, [#allocation6], %s1809_s18, %s1809_s18, %s1810_s19  }
  0x19   :  { %1802 = dma.done.wait [#allocation3], 4096  }
  0x1a   :  { %1803 = vsyncadd [#allocation3], 4294963200 }
  0x1b   :  { %1804 = dma.done.wait [#allocation6], 1024  }
  0x1c   :  { %1805 = vsyncadd [#allocation6], 4294966272  ;;  %v1702_v0 = vld [vmem:[#allocation5 + $0x38] sm:$0xff]   ;;  %v1703_v1 = vld [vmem:[#allocation5 + $0x30] sm:$0xff]  }
  0x1d   :  { %1601 = vmatprep.subr.bf16.mxu0 %v1702_v0  ;;  %1681 = vmatprep.subr.bf16.mxu1 %v1702_v0  ;;  %v1704_v2 = vld [vmem:[#allocation5 + $0x28] sm:$0xff]   ;;  %v1705_v3 = vld [vmem:[#allocation5 + $0x20] sm:$0xff]   ;;  %v1706_v6 = vld [vmem:[#allocation5 + $0x18] sm:$0xff]  }
  0x1e   :  { %1602 = vmatpush3.bf16.msra.mxu0 %v1702_v0  ;;  %1689 = vmatpush3.bf16.msra.mxu1 %v1702_v0  ;;  %v1710_v4 = vld [vmem:[#allocation2] sm:$0xff]   ;;  %v1707_v7 = vld [vmem:[#allocation5 + $0x10] sm:$0xff]   ;;  %v1708_v8 = vld [vmem:[#allocation5 + $0x8] sm:$0xff]  }
  0x1f   :  { %1603 = vmatprep.subr.bf16.mxu0 %v1703_v1  ;;  %1682 = vmatprep.subr.bf16.mxu1 %v1703_v1  ;;  %v1711_v5 = vld [vmem:[#allocation2 + $0x80] sm:$0xff]   ;;  %v1712_v10 = vld [vmem:[#allocation2 + $0x8] sm:$0xff]   ;;  %v1714_v12 = vld [vmem:[#allocation2 + $0x10] sm:$0xff]  }
  0x20   :  { %1617 = vmatprep.mubr.bf16.mxu0 %v1710_v4  ;;  %1649 = vmatprep.mubr.bf16.mxu1 %v1711_v5  ;;  %v1709_v9 = vld [vmem:[#allocation5] sm:$0xff]   ;;  %v1713_v11 = vld [vmem:[#allocation2 + $0x88] sm:$0xff]   ;;  %v1715_v13 = vld [vmem:[#allocation2 + $0x90] sm:$0xff]  }
  0x21   :  { %v1716_v14 = vld [vmem:[#allocation2 + $0x18] sm:$0xff]   ;;  %v1718_v16 = vld [vmem:[#allocation2 + $0x20] sm:$0xff]   ;;  %v1720_v18 = vld [vmem:[#allocation2 + $0x28] sm:$0xff]  }
  0x22   :  { %1604 = vmatpush3.bf16.msra.mxu0 %v1703_v1  ;;  %1690 = vmatpush3.bf16.msra.mxu1 %v1703_v1  ;;  %v1717_v15 = vld [vmem:[#allocation2 + $0x98] sm:$0xff]   ;;  %v1719_v17 = vld [vmem:[#allocation2 + $0xa0] sm:$0xff]   ;;  %v1721_v19 = vld [vmem:[#allocation2 + $0xa8] sm:$0xff]  }
  0x23   :  { %1605 = vmatprep.subr.bf16.mxu0 %v1704_v2  ;;  %1683 = vmatprep.subr.bf16.mxu1 %v1704_v2  ;;  %v1722_v20 = vld [vmem:[#allocation2 + $0x30] sm:$0xff]   ;;  %v1724_v22 = vld [vmem:[#allocation2 + $0x38] sm:$0xff]   ;;  %v1726_v24 = vld [vmem:[#allocation2 + $0x40] sm:$0xff]  }
  0x24   :  { %v1723_v21 = vld [vmem:[#allocation2 + $0xb0] sm:$0xff]   ;;  %v1725_v23 = vld [vmem:[#allocation2 + $0xb8] sm:$0xff]   ;;  %v1727_v25 = vld [vmem:[#allocation2 + $0xc0] sm:$0xff]  }
  0x25   :  { %v1728_v26 = vld [vmem:[#allocation2 + $0x48] sm:$0xff]   ;;  %v1730_v28 = vld [vmem:[#allocation2 + $0x50] sm:$0xff]   ;;  %v1732_v30 = vld [vmem:[#allocation2 + $0x58] sm:$0xff]  }
  0x26   :  { %1606 = vmatpush3.bf16.msra.mxu0 %v1704_v2  ;;  %1691 = vmatpush3.bf16.msra.mxu1 %v1704_v2  ;;  %v1729_v27 = vld [vmem:[#allocation2 + $0xc8] sm:$0xff]   ;;  %v1731_v29 = vld [vmem:[#allocation2 + $0xd0] sm:$0xff]   ;;  %v1733_v31 = vld [vmem:[#allocation2 + $0xd8] sm:$0xff]  }
  0x27   :  { %1607 = vmatprep.subr.bf16.mxu0 %v1705_v3  ;;  %1684 = vmatprep.subr.bf16.mxu1 %v1705_v3  ;;  %v1734_v32 = vld [vmem:[#allocation2 + $0x60] sm:$0xff]   ;;  %v1736_v34 = vld [vmem:[#allocation2 + $0x68] sm:$0xff]   ;;  %v1738_v36 = vld [vmem:[#allocation2 + $0x70] sm:$0xff]  }
  0x28   :  { %v1735_v33 = vld [vmem:[#allocation2 + $0xe0] sm:$0xff]   ;;  %v1737_v35 = vld [vmem:[#allocation2 + $0xe8] sm:$0xff]   ;;  %v1739_v37 = vld [vmem:[#allocation2 + $0xf0] sm:$0xff]  }
  0x29   :  { %v1740_v38 = vld [vmem:[#allocation2 + $0x78] sm:$0xff]   ;;  %v1853_v40 = vld [vmem:[%s1996_s2] ss:$0 sm:$0xff]  ;;  %s1812_s2 = smov [#allocation7]  }
  0x2a   :  { %1608 = vmatpush3.bf16.msra.mxu0 %v1705_v3  ;;  %1692 = vmatpush3.bf16.msra.mxu1 %v1705_v3  ;;  %v1741_v39 = vld [vmem:[#allocation2 + $0xf8] sm:$0xff]   ;;  %v1860_v45 = vld [vmem:[%s1997_s3] ss:$0 sm:$0xff]  ;;  %s1187_s3 = sshll.u32 %s1812_s2, 4  ;;  %s1188_s3 = int_to_ptr.vmem [resolvable:$true] %s1187_s3 }
  0x2b   :  { %1609 = vmatprep.subr.bf16.mxu0 %v1706_v6  ;;  %1685 = vmatprep.subr.bf16.mxu1 %v1706_v6  ;;  %s1782_s29 = scalar_lea.vmem %s1188_s3, 4096  ;;  %p1787_p11 = scmp.lt.s32.totalorder %s1188_s3, %s1188_s3 }
  0x2c   :  { %p1783_p10 = scmp.ne.s32.totalorder %s1188_s3, %s1782_s29  ;;  %p1788_p12 = scmp.lt.s32.totalorder %s1782_s29, %s1782_s29 }
  0x2e   :  { %1610 = vmatpush3.bf16.msra.mxu0 %v1706_v6  ;;  %1693 = vmatpush3.bf16.msra.mxu1 %v1706_v6  ;;  %p1789_p13 = por %p1788_p12, %p1787_p11 }
  0x2f   :  { %1611 = vmatprep.subr.bf16.mxu0 %v1707_v7  ;;  %1686 = vmatprep.subr.bf16.mxu1 %v1707_v7 }
  0x30   :  { %p1790_p0 = pnand %p1789_p13, %p1783_p10 }
  0x32   :  { %1612 = vmatpush3.bf16.msra.mxu0 %v1707_v7  ;;  %1694 = vmatpush3.bf16.msra.mxu1 %v1707_v7 }
  0x33   :  { %1613 = vmatprep.subr.bf16.mxu0 %v1708_v8  ;;  %1687 = vmatprep.subr.bf16.mxu1 %v1708_v8 }
  0x36   :  { %1614 = vmatpush3.bf16.msra.mxu0 %v1708_v8  ;;  %1695 = vmatpush3.bf16.msra.mxu1 %v1708_v8 }
  0x37   :  { %1615 = vmatprep.subr.bf16.mxu0 %v1709_v9  ;;  %1688 = vmatprep.subr.bf16.mxu1 %v1709_v9 }
  0x3a   :  { %1616 = vmatpush3.bf16.msra.mxu0 %v1709_v9  ;;  %1696 = vmatpush3.bf16.msra.mxu1 %v1709_v9 }
  0x3d   :  { %1618 = vmatmul.mubr.bf16.vlgmr.msra.gmra.mxu0 %v1712_v10  ;;  %1650 = vmatmul.mubr.bf16.vlgmr.msra.gmra.mxu1 %v1713_v11 }
  0x3e   :  { %1621 = vmatprep.mubr.bf16.mxu0 %v1714_v12  ;;  %1653 = vmatprep.mubr.bf16.mxu1 %v1715_v13 }
  0x45   :  { %1622 = vmatmul.mubr.bf16.gmra.mxu0 %v1716_v14  ;;  %1654 = vmatmul.mubr.bf16.gmra.mxu1 %v1717_v15 }
  0x46   :  { %1625 = vmatprep.mubr.bf16.mxu0 %v1718_v16  ;;  %1657 = vmatprep.mubr.bf16.mxu1 %v1719_v17 }
  0x4d   :  { %1626 = vmatmul.mubr.bf16.gmra.mxu0 %v1720_v18  ;;  %1658 = vmatmul.mubr.bf16.gmra.mxu1 %v1721_v19 }
  0x4e   :  { %1629 = vmatprep.mubr.bf16.mxu0 %v1722_v20  ;;  %1661 = vmatprep.mubr.bf16.mxu1 %v1723_v21 }
  0x55   :  { %1630 = vmatmul.mubr.bf16.gmra.mxu0 %v1724_v22  ;;  %1662 = vmatmul.mubr.bf16.gmra.mxu1 %v1725_v23 }
  0x56   :  { %1633 = vmatprep.mubr.bf16.mxu0 %v1726_v24  ;;  %1665 = vmatprep.mubr.bf16.mxu1 %v1727_v25 }
  0x5d   :  { %1634 = vmatmul.mubr.bf16.gmra.mxu0 %v1728_v26  ;;  %1666 = vmatmul.mubr.bf16.gmra.mxu1 %v1729_v27 }
  0x5e   :  { %1637 = vmatprep.mubr.bf16.mxu0 %v1730_v28  ;;  %1669 = vmatprep.mubr.bf16.mxu1 %v1731_v29 }
  0x65   :  { %1638 = vmatmul.mubr.bf16.gmra.mxu0 %v1732_v30  ;;  %1670 = vmatmul.mubr.bf16.gmra.mxu1 %v1733_v31 }
  0x66   :  { %1641 = vmatprep.mubr.bf16.mxu0 %v1734_v32  ;;  %1673 = vmatprep.mubr.bf16.mxu1 %v1735_v33 }
  0x6d   :  { %1642 = vmatmul.mubr.bf16.gmra.mxu0 %v1736_v34  ;;  %1674 = vmatmul.mubr.bf16.gmra.mxu1 %v1737_v35 }
  0x6e   :  { %1645 = vmatprep.mubr.bf16.mxu0 %v1738_v36  ;;  %1677 = vmatprep.mubr.bf16.mxu1 %v1739_v37 }
  0x75   :  { %1646 = vmatmul.mubr.bf16.gmra.mxu0 %v1740_v38  ;;  %1678 = vmatmul.mubr.bf16.gmra.mxu1 %v1741_v39 }
  0xfd   :  { %v1619_v41 = vpop.f32.mrf.mxu0  ;;  %v1651_v42 = vpop.f32.mrf.mxu1 }
  0xfe   :  { %v665_v43 = vmul.f32 %v1619_v41, %v1853_v40  ;;  %v697_v44 = vmul.f32 %v1651_v42, %v1853_v40 }
  0xff   :  { %v401_v46 = vpop.f32.mrf.mxu0  ;;  %v529_v47 = vpop.f32.mrf.mxu1 }
 0x100   :  { %v663_v48 = vmul.f32 %v1853_v40, %v401_v46  ;;  %v695_v49 = vmul.f32 %v1853_v40, %v529_v47  ;;  %v736_v52 = vadd.f32 %v1860_v45, %v665_v43  ;;  %v768_v53 = vadd.f32 %v1860_v45, %v697_v44 }
 0x101   :  { %v1620_v50 = vpop.f32.mrf.mxu0  ;;  %v1652_v51 = vpop.f32.mrf.mxu1 }
 0x102   :  { %v666_v54 = vmul.f32 %v1620_v50, %v1853_v40  ;;  %v698_v55 = vmul.f32 %v1652_v51, %v1853_v40  ;;  %v734_v58 = vadd.f32 %v1860_v45, %v663_v48  ;;  %v766_v59 = vadd.f32 %v1860_v45, %v695_v49 }
 0x103   :  { %v404_v56 = vpop.f32.mrf.mxu0  ;;  %v532_v57 = vpop.f32.mrf.mxu1  ;;  %v800_v2 = vmax.f32 %v736_v52, 0.0  ;;  %v832_v3 = vmax.f32 %v768_v53, 0.0 }
 0x104   :  { %v664_v60 = vmul.f32 %v1853_v40, %v404_v56  ;;  %v696_v61 = vmul.f32 %v1853_v40, %v532_v57  ;;  %v737_v62 = vadd.f32 %v1860_v45, %v666_v54  ;;  %v769_v63 = vadd.f32 %v1860_v45, %v698_v55 }
 0x105   :  { %v1623_v0 = vpop.f32.mrf.mxu0  ;;  %v1655_v1 = vpop.f32.mrf.mxu1  ;;  %v798_v12 = vmax.f32 %v734_v58, 0.0  ;;  %v830_v13 = vmax.f32 %v766_v59, 0.0 }
 0x106   :  { %v735_v4 = vadd.f32 %v1860_v45, %v664_v60  ;;  %v767_v5 = vadd.f32 %v1860_v45, %v696_v61  ;;  %v801_v6 = vmax.f32 %v737_v62, 0.0  ;;  %v833_v7 = vmax.f32 %v769_v63, 0.0 }
 0x107   :  { %v669_v8 = vmul.f32 %v1623_v0, %v1853_v40  ;;  %v701_v9 = vmul.f32 %v1655_v1, %v1853_v40  ;;  %v417_v10 = vpop.f32.mrf.mxu0  ;;  %v545_v11 = vpop.f32.mrf.mxu1 }
 0x108   :  { %v799_v14 = vmax.f32 %v735_v4, 0.0  ;;  %v831_v15 = vmax.f32 %v767_v5, 0.0  ;;  %v1378_v16 = vpack.c.bf16 %v801_v6, %v800_v2  ;;  %v1458_v17 = vpack.c.bf16 %v833_v7, %v832_v3 }
 0x109   :  { %v667_v18 = vmul.f32 %v1853_v40, %v417_v10  ;;  %v699_v19 = vmul.f32 %v1853_v40, %v545_v11  ;;  %v1624_v20 = vpop.f32.mrf.mxu0  ;;  %v1656_v21 = vpop.f32.mrf.mxu1  ;;  %v740_v24 = vadd.f32 %v1860_v45, %v669_v8  ;;  %v772_v25 = vadd.f32 %v1860_v45, %v701_v9 }
 0x10a   :  { %v1373_v22 = vpack.c.bf16 %v799_v14, %v798_v12  ;;  %v1453_v23 = vpack.c.bf16 %v831_v15, %v830_v13  ;;  %1530 = vst [vmem:[#allocation7 + $0x8] sm:$0xff] %v1378_v16   ;;  %1546 = vst [vmem:[#allocation7 + $0x88] sm:$0xff] %v1458_v17   ;;  %v670_v26 = vmul.f32 %v1624_v20, %v1853_v40 }
 0x10b   :  { %v702_v27 = vmul.f32 %v1656_v21, %v1853_v40  ;;  %v420_v28 = vpop.f32.mrf.mxu0  ;;  %v548_v29 = vpop.f32.mrf.mxu1  ;;  %v738_v30 = vadd.f32 %v1860_v45, %v667_v18  ;;  %v770_v31 = vadd.f32 %v1860_v45, %v699_v19  ;;  %v804_v43 = vmax.f32 %v740_v24, 0.0 }
 0x10c   :  { %1374 = vst [vmem:[#allocation7] sm:$0xff] %v1373_v22   ;;  %1545 = vst [vmem:[#allocation7 + $0x80] sm:$0xff] %v1453_v23   ;;  %v668_v32 = vmul.f32 %v1853_v40, %v420_v28  ;;  %v700_v33 = vmul.f32 %v1853_v40, %v548_v29  ;;  %v741_v34 = vadd.f32 %v1860_v45, %v670_v26  ;;  %v836_v44 = vmax.f32 %v772_v25, 0.0 }
 0x10d   :  { %v773_v35 = vadd.f32 %v1860_v45, %v702_v27  ;;  %v1627_v36 = vpop.f32.mrf.mxu0  ;;  %v1659_v37 = vpop.f32.mrf.mxu1  ;;  %v802_v50 = vmax.f32 %v738_v30, 0.0  ;;  %v834_v51 = vmax.f32 %v770_v31, 0.0 }
 0x10e   :  { %v739_v38 = vadd.f32 %v1860_v45, %v668_v32  ;;  %v771_v39 = vadd.f32 %v1860_v45, %v700_v33  ;;  %v673_v41 = vmul.f32 %v1627_v36, %v1853_v40  ;;  %v705_v42 = vmul.f32 %v1659_v37, %v1853_v40 }
 0x10f   :  { %v805_v46 = vmax.f32 %v741_v34, 0.0  ;;  %v837_v47 = vmax.f32 %v773_v35, 0.0  ;;  %v433_v48 = vpop.f32.mrf.mxu0  ;;  %v561_v49 = vpop.f32.mrf.mxu1 }
 0x110   :  { %v803_v52 = vmax.f32 %v739_v38, 0.0  ;;  %v835_v53 = vmax.f32 %v771_v39, 0.0  ;;  %v671_v56 = vmul.f32 %v1853_v40, %v433_v48  ;;  %v703_v57 = vmul.f32 %v1853_v40, %v561_v49 }
 0x111   :  { %v1388_v54 = vpack.c.bf16 %v805_v46, %v804_v43  ;;  %v1468_v55 = vpack.c.bf16 %v837_v47, %v836_v44  ;;  %v1628_v58 = vpop.f32.mrf.mxu0  ;;  %v1660_v59 = vpop.f32.mrf.mxu1  ;;  %v744_v62 = vadd.f32 %v1860_v45, %v673_v41  ;;  %v776_v63 = vadd.f32 %v1860_v45, %v705_v42 }
 0x112   :  { %v1383_v60 = vpack.c.bf16 %v803_v52, %v802_v50  ;;  %v1463_v61 = vpack.c.bf16 %v835_v53, %v834_v51  ;;  %v674_v0 = vmul.f32 %v1628_v58, %v1853_v40  ;;  %v706_v1 = vmul.f32 %v1660_v59, %v1853_v40 }
 0x113   :  { %1532 = vst [vmem:[#allocation7 + $0x18] sm:$0xff] %v1388_v54   ;;  %1548 = vst [vmem:[#allocation7 + $0x98] sm:$0xff] %v1468_v55   ;;  %v436_v2 = vpop.f32.mrf.mxu0  ;;  %v564_v3 = vpop.f32.mrf.mxu1  ;;  %v742_v4 = vadd.f32 %v1860_v45, %v671_v56  ;;  %v774_v5 = vadd.f32 %v1860_v45, %v703_v57  ;;  %v808_v12 = vmax.f32 %v744_v62, 0.0  ;;  %v840_v13 = vmax.f32 %v776_v63, 0.0 }
 0x114   :  { %1531 = vst [vmem:[#allocation7 + $0x10] sm:$0xff] %v1383_v60   ;;  %1547 = vst [vmem:[#allocation7 + $0x90] sm:$0xff] %v1463_v61   ;;  %v672_v6 = vmul.f32 %v1853_v40, %v436_v2  ;;  %v704_v7 = vmul.f32 %v1853_v40, %v564_v3  ;;  %v745_v8 = vadd.f32 %v1860_v45, %v674_v0 }
 0x115   :  { %v777_v9 = vadd.f32 %v1860_v45, %v706_v1  ;;  %v1631_v10 = vpop.f32.mrf.mxu0  ;;  %v1663_v11 = vpop.f32.mrf.mxu1  ;;  %v806_v22 = vmax.f32 %v742_v4, 0.0  ;;  %v838_v23 = vmax.f32 %v774_v5, 0.0 }
 0x116   :  { %v743_v14 = vadd.f32 %v1860_v45, %v672_v6  ;;  %v775_v15 = vadd.f32 %v1860_v45, %v704_v7  ;;  %v809_v16 = vmax.f32 %v745_v8, 0.0  ;;  %v677_v18 = vmul.f32 %v1631_v10, %v1853_v40 }
 0x117   :  { %v841_v17 = vmax.f32 %v777_v9, 0.0  ;;  %v709_v19 = vmul.f32 %v1663_v11, %v1853_v40  ;;  %v449_v20 = vpop.f32.mrf.mxu0  ;;  %v577_v21 = vpop.f32.mrf.mxu1 }
 0x118   :  { %v807_v24 = vmax.f32 %v743_v14, 0.0  ;;  %v839_v25 = vmax.f32 %v775_v15, 0.0  ;;  %v1398_v26 = vpack.c.bf16 %v809_v16, %v808_v12  ;;  %v675_v28 = vmul.f32 %v1853_v40, %v449_v20 }
 0x119   :  { %v1478_v27 = vpack.c.bf16 %v841_v17, %v840_v13  ;;  %v707_v29 = vmul.f32 %v1853_v40, %v577_v21  ;;  %v1632_v30 = vpop.f32.mrf.mxu0  ;;  %v1664_v31 = vpop.f32.mrf.mxu1  ;;  %v748_v34 = vadd.f32 %v1860_v45, %v677_v18  ;;  %v780_v35 = vadd.f32 %v1860_v45, %v709_v19 }
 0x11a   :  { %v1393_v32 = vpack.c.bf16 %v807_v24, %v806_v22  ;;  %v1473_v33 = vpack.c.bf16 %v839_v25, %v838_v23  ;;  %1534 = vst [vmem:[#allocation7 + $0x28] sm:$0xff] %v1398_v26   ;;  %v678_v36 = vmul.f32 %v1632_v30, %v1853_v40  ;;  %v710_v37 = vmul.f32 %v1664_v31, %v1853_v40 }
 0x11b   :  { %1550 = vst [vmem:[#allocation7 + $0xa8] sm:$0xff] %v1478_v27   ;;  %v452_v38 = vpop.f32.mrf.mxu0  ;;  %v580_v39 = vpop.f32.mrf.mxu1  ;;  %v746_v41 = vadd.f32 %v1860_v45, %v675_v28  ;;  %v778_v42 = vadd.f32 %v1860_v45, %v707_v29  ;;  %v812_v54 = vmax.f32 %v748_v34, 0.0  ;;  %v844_v55 = vmax.f32 %v780_v35, 0.0 }
 0x11c   :  { %1533 = vst [vmem:[#allocation7 + $0x20] sm:$0xff] %v1393_v32   ;;  %1549 = vst [vmem:[#allocation7 + $0xa0] sm:$0xff] %v1473_v33   ;;  %v676_v43 = vmul.f32 %v1853_v40, %v452_v38  ;;  %v708_v44 = vmul.f32 %v1853_v40, %v580_v39  ;;  %v749_v46 = vadd.f32 %v1860_v45, %v678_v36 }
 0x11d   :  { %v781_v47 = vadd.f32 %v1860_v45, %v710_v37  ;;  %v1635_v48 = vpop.f32.mrf.mxu0  ;;  %v1667_v49 = vpop.f32.mrf.mxu1  ;;  %v810_v60 = vmax.f32 %v746_v41, 0.0  ;;  %v842_v61 = vmax.f32 %v778_v42, 0.0 }
 0x11e   :  { %v747_v50 = vadd.f32 %v1860_v45, %v676_v43  ;;  %v779_v51 = vadd.f32 %v1860_v45, %v708_v44  ;;  %v681_v52 = vmul.f32 %v1635_v48, %v1853_v40  ;;  %v713_v53 = vmul.f32 %v1667_v49, %v1853_v40 }
 0x11f   :  { %v813_v56 = vmax.f32 %v749_v46, 0.0  ;;  %v845_v57 = vmax.f32 %v781_v47, 0.0  ;;  %v465_v58 = vpop.f32.mrf.mxu0  ;;  %v593_v59 = vpop.f32.mrf.mxu1 }
 0x120   :  { %v811_v62 = vmax.f32 %v747_v50, 0.0  ;;  %v843_v63 = vmax.f32 %v779_v51, 0.0  ;;  %v679_v2 = vmul.f32 %v1853_v40, %v465_v58  ;;  %v711_v3 = vmul.f32 %v1853_v40, %v593_v59 }
 0x121   :  { %v1408_v0 = vpack.c.bf16 %v813_v56, %v812_v54  ;;  %v1488_v1 = vpack.c.bf16 %v845_v57, %v844_v55  ;;  %v1636_v4 = vpop.f32.mrf.mxu0  ;;  %v1668_v5 = vpop.f32.mrf.mxu1  ;;  %v752_v8 = vadd.f32 %v1860_v45, %v681_v52  ;;  %v784_v9 = vadd.f32 %v1860_v45, %v713_v53 }
 0x122   :  { %v1403_v6 = vpack.c.bf16 %v811_v62, %v810_v60  ;;  %v1483_v7 = vpack.c.bf16 %v843_v63, %v842_v61  ;;  %v682_v10 = vmul.f32 %v1636_v4, %v1853_v40  ;;  %v714_v11 = vmul.f32 %v1668_v5, %v1853_v40 }
 0x123   :  { %1536 = vst [vmem:[#allocation7 + $0x38] sm:$0xff] %v1408_v0   ;;  %1552 = vst [vmem:[#allocation7 + $0xb8] sm:$0xff] %v1488_v1   ;;  %v468_v12 = vpop.f32.mrf.mxu0  ;;  %v596_v13 = vpop.f32.mrf.mxu1  ;;  %v750_v14 = vadd.f32 %v1860_v45, %v679_v2  ;;  %v782_v15 = vadd.f32 %v1860_v45, %v711_v3  ;;  %v816_v22 = vmax.f32 %v752_v8, 0.0  ;;  %v848_v23 = vmax.f32 %v784_v9, 0.0 }
 0x124   :  { %1535 = vst [vmem:[#allocation7 + $0x30] sm:$0xff] %v1403_v6   ;;  %1551 = vst [vmem:[#allocation7 + $0xb0] sm:$0xff] %v1483_v7   ;;  %v680_v16 = vmul.f32 %v1853_v40, %v468_v12  ;;  %v712_v17 = vmul.f32 %v1853_v40, %v596_v13  ;;  %v753_v18 = vadd.f32 %v1860_v45, %v682_v10 }
 0x125   :  { %v785_v19 = vadd.f32 %v1860_v45, %v714_v11  ;;  %v1639_v20 = vpop.f32.mrf.mxu0  ;;  %v1671_v21 = vpop.f32.mrf.mxu1  ;;  %v814_v32 = vmax.f32 %v750_v14, 0.0  ;;  %v846_v33 = vmax.f32 %v782_v15, 0.0 }
 0x126   :  { %v751_v24 = vadd.f32 %v1860_v45, %v680_v16  ;;  %v783_v25 = vadd.f32 %v1860_v45, %v712_v17  ;;  %v817_v26 = vmax.f32 %v753_v18, 0.0  ;;  %v685_v28 = vmul.f32 %v1639_v20, %v1853_v40 }
 0x127   :  { %v849_v27 = vmax.f32 %v785_v19, 0.0  ;;  %v717_v29 = vmul.f32 %v1671_v21, %v1853_v40  ;;  %v481_v30 = vpop.f32.mrf.mxu0  ;;  %v609_v31 = vpop.f32.mrf.mxu1 }
 0x128   :  { %v815_v34 = vmax.f32 %v751_v24, 0.0  ;;  %v847_v35 = vmax.f32 %v783_v25, 0.0  ;;  %v1418_v36 = vpack.c.bf16 %v817_v26, %v816_v22  ;;  %v683_v38 = vmul.f32 %v1853_v40, %v481_v30 }
 0x129   :  { %v1498_v37 = vpack.c.bf16 %v849_v27, %v848_v23  ;;  %v715_v39 = vmul.f32 %v1853_v40, %v609_v31  ;;  %v1640_v41 = vpop.f32.mrf.mxu0  ;;  %v1672_v42 = vpop.f32.mrf.mxu1  ;;  %v756_v46 = vadd.f32 %v1860_v45, %v685_v28  ;;  %v788_v47 = vadd.f32 %v1860_v45, %v717_v29 }
 0x12a   :  { %v1413_v43 = vpack.c.bf16 %v815_v34, %v814_v32  ;;  %v1493_v44 = vpack.c.bf16 %v847_v35, %v846_v33  ;;  %1538 = vst [vmem:[#allocation7 + $0x48] sm:$0xff] %v1418_v36   ;;  %v686_v48 = vmul.f32 %v1640_v41, %v1853_v40  ;;  %v718_v49 = vmul.f32 %v1672_v42, %v1853_v40 }
 0x12b   :  { %1554 = vst [vmem:[#allocation7 + $0xc8] sm:$0xff] %v1498_v37   ;;  %v484_v50 = vpop.f32.mrf.mxu0  ;;  %v612_v51 = vpop.f32.mrf.mxu1  ;;  %v754_v52 = vadd.f32 %v1860_v45, %v683_v38  ;;  %v786_v53 = vadd.f32 %v1860_v45, %v715_v39  ;;  %v820_v0 = vmax.f32 %v756_v46, 0.0  ;;  %v852_v1 = vmax.f32 %v788_v47, 0.0 }
 0x12c   :  { %1537 = vst [vmem:[#allocation7 + $0x40] sm:$0xff] %v1413_v43   ;;  %1553 = vst [vmem:[#allocation7 + $0xc0] sm:$0xff] %v1493_v44   ;;  %v684_v54 = vmul.f32 %v1853_v40, %v484_v50  ;;  %v716_v55 = vmul.f32 %v1853_v40, %v612_v51  ;;  %v757_v56 = vadd.f32 %v1860_v45, %v686_v48 }
 0x12d   :  { %v789_v57 = vadd.f32 %v1860_v45, %v718_v49  ;;  %v1643_v58 = vpop.f32.mrf.mxu0  ;;  %v1675_v59 = vpop.f32.mrf.mxu1  ;;  %v818_v6 = vmax.f32 %v754_v52, 0.0  ;;  %v850_v7 = vmax.f32 %v786_v53, 0.0 }
 0x12e   :  { %v755_v60 = vadd.f32 %v1860_v45, %v684_v54  ;;  %v787_v61 = vadd.f32 %v1860_v45, %v716_v55  ;;  %v689_v62 = vmul.f32 %v1643_v58, %v1853_v40  ;;  %v721_v63 = vmul.f32 %v1675_v59, %v1853_v40 }
 0x12f   :  { %v821_v2 = vmax.f32 %v757_v56, 0.0  ;;  %v853_v3 = vmax.f32 %v789_v57, 0.0  ;;  %v497_v4 = vpop.f32.mrf.mxu0  ;;  %v625_v5 = vpop.f32.mrf.mxu1 }
 0x130   :  { %v819_v8 = vmax.f32 %v755_v60, 0.0  ;;  %v851_v9 = vmax.f32 %v787_v61, 0.0  ;;  %v687_v12 = vmul.f32 %v1853_v40, %v497_v4  ;;  %v719_v13 = vmul.f32 %v1853_v40, %v625_v5 }
 0x131   :  { %v1428_v10 = vpack.c.bf16 %v821_v2, %v820_v0  ;;  %v1508_v11 = vpack.c.bf16 %v853_v3, %v852_v1  ;;  %v1644_v14 = vpop.f32.mrf.mxu0  ;;  %v1676_v15 = vpop.f32.mrf.mxu1  ;;  %v760_v18 = vadd.f32 %v1860_v45, %v689_v62  ;;  %v792_v19 = vadd.f32 %v1860_v45, %v721_v63 }
 0x132   :  { %v1423_v16 = vpack.c.bf16 %v819_v8, %v818_v6  ;;  %v1503_v17 = vpack.c.bf16 %v851_v9, %v850_v7  ;;  %v690_v20 = vmul.f32 %v1644_v14, %v1853_v40  ;;  %v722_v21 = vmul.f32 %v1676_v15, %v1853_v40 }
 0x133   :  { %1540 = vst [vmem:[#allocation7 + $0x58] sm:$0xff] %v1428_v10   ;;  %1556 = vst [vmem:[#allocation7 + $0xd8] sm:$0xff] %v1508_v11   ;;  %v500_v22 = vpop.f32.mrf.mxu0  ;;  %v628_v23 = vpop.f32.mrf.mxu1  ;;  %v758_v24 = vadd.f32 %v1860_v45, %v687_v12  ;;  %v790_v25 = vadd.f32 %v1860_v45, %v719_v13  ;;  %v824_v32 = vmax.f32 %v760_v18, 0.0  ;;  %v856_v33 = vmax.f32 %v792_v19, 0.0 }
 0x134   :  { %1539 = vst [vmem:[#allocation7 + $0x50] sm:$0xff] %v1423_v16   ;;  %1555 = vst [vmem:[#allocation7 + $0xd0] sm:$0xff] %v1503_v17   ;;  %v688_v26 = vmul.f32 %v1853_v40, %v500_v22  ;;  %v720_v27 = vmul.f32 %v1853_v40, %v628_v23  ;;  %v761_v28 = vadd.f32 %v1860_v45, %v690_v20 }
 0x135   :  { %v793_v29 = vadd.f32 %v1860_v45, %v722_v21  ;;  %v1647_v30 = vpop.f32.mrf.mxu0  ;;  %v1679_v31 = vpop.f32.mrf.mxu1  ;;  %v822_v43 = vmax.f32 %v758_v24, 0.0  ;;  %v854_v44 = vmax.f32 %v790_v25, 0.0 }
 0x136   :  { %v759_v34 = vadd.f32 %v1860_v45, %v688_v26  ;;  %v791_v35 = vadd.f32 %v1860_v45, %v720_v27  ;;  %v825_v36 = vmax.f32 %v761_v28, 0.0  ;;  %v693_v38 = vmul.f32 %v1647_v30, %v1853_v40 }
 0x137   :  { %v857_v37 = vmax.f32 %v793_v29, 0.0  ;;  %v725_v39 = vmul.f32 %v1679_v31, %v1853_v40  ;;  %v513_v41 = vpop.f32.mrf.mxu0  ;;  %v641_v42 = vpop.f32.mrf.mxu1 }
 0x138   :  { %v823_v46 = vmax.f32 %v759_v34, 0.0  ;;  %v855_v47 = vmax.f32 %v791_v35, 0.0  ;;  %v1438_v48 = vpack.c.bf16 %v825_v36, %v824_v32  ;;  %v691_v50 = vmul.f32 %v1853_v40, %v513_v41 }
 0x139   :  { %v1518_v49 = vpack.c.bf16 %v857_v37, %v856_v33  ;;  %v723_v51 = vmul.f32 %v1853_v40, %v641_v42  ;;  %v1648_v52 = vpop.f32.mrf.mxu0  ;;  %v1680_v53 = vpop.f32.mrf.mxu1  ;;  %v764_v56 = vadd.f32 %v1860_v45, %v693_v38  ;;  %v796_v57 = vadd.f32 %v1860_v45, %v725_v39 }
 0x13a   :  { %v1433_v54 = vpack.c.bf16 %v823_v46, %v822_v43  ;;  %v1513_v55 = vpack.c.bf16 %v855_v47, %v854_v44  ;;  %1542 = vst [vmem:[#allocation7 + $0x68] sm:$0xff] %v1438_v48   ;;  %v694_v58 = vmul.f32 %v1648_v52, %v1853_v40  ;;  %v726_v59 = vmul.f32 %v1680_v53, %v1853_v40 }
 0x13b   :  { %1558 = vst [vmem:[#allocation7 + $0xe8] sm:$0xff] %v1518_v49   ;;  %v516_v60 = vpop.f32.mrf.mxu0  ;;  %v644_v61 = vpop.f32.mrf.mxu1  ;;  %v762_v62 = vadd.f32 %v1860_v45, %v691_v50  ;;  %v794_v63 = vadd.f32 %v1860_v45, %v723_v51  ;;  %v828_v6 = vmax.f32 %v764_v56, 0.0  ;;  %v860_v7 = vmax.f32 %v796_v57, 0.0 }
 0x13c   :  { %1541 = vst [vmem:[#allocation7 + $0x60] sm:$0xff] %v1433_v54   ;;  %1557 = vst [vmem:[#allocation7 + $0xe0] sm:$0xff] %v1513_v55   ;;  %v692_v0 = vmul.f32 %v1853_v40, %v516_v60  ;;  %v724_v1 = vmul.f32 %v1853_v40, %v644_v61  ;;  %v765_v2 = vadd.f32 %v1860_v45, %v694_v58 }
 0x13d   :  { %v797_v3 = vadd.f32 %v1860_v45, %v726_v59  ;;  %v826_v10 = vmax.f32 %v762_v62, 0.0  ;;  %v858_v11 = vmax.f32 %v794_v63, 0.0 }
 0x13e   :  { %v763_v4 = vadd.f32 %v1860_v45, %v692_v0  ;;  %v795_v5 = vadd.f32 %v1860_v45, %v724_v1  ;;  %v829_v8 = vmax.f32 %v765_v2, 0.0 }
 0x13f   :  { %v861_v9 = vmax.f32 %v797_v3, 0.0 }
 0x140   :  { %v827_v12 = vmax.f32 %v763_v4, 0.0  ;;  %v859_v13 = vmax.f32 %v795_v5, 0.0  ;;  %v1448_v14 = vpack.c.bf16 %v829_v8, %v828_v6 }
 0x141   :  { %v1528_v40 = vpack.c.bf16 %v861_v9, %v860_v7 }
 0x142   :  { %v1443_v15 = vpack.c.bf16 %v827_v12, %v826_v10  ;;  %v1523_v16 = vpack.c.bf16 %v859_v13, %v858_v11  ;;  %1544 = vst [vmem:[#allocation7 + $0x78] sm:$0xff] %v1448_v14  }
 0x143   :  { %1560 = vst [vmem:[#allocation7 + $0xf8] sm:$0xff] %v1528_v40  }
 0x144   :  { %1543 = vst [vmem:[#allocation7 + $0x70] sm:$0xff] %v1443_v15   ;;  %1559 = vst [vmem:[#allocation7 + $0xf0] sm:$0xff] %v1523_v16  }
 0x145   :  { %1793 = shalt.err (!%p1790_p0)
}
 0x146   :  { %1193 = dma.vmem_to_hbm [thread:$0]  %s1188_s3, 4096, %s1998_s4, [#allocation4], %s1809_s18, %s1809_s18, %s1810_s19  }
 0x147   :  { %1806 = dma.done.wait [#allocation4], 4096  }
 0x148   :  { %1807 = vsyncadd [#allocation4], 4294963200 }
 0x149   :  { %1197 = vsyncpa [#allocation3], 1 }
 0x14a   :  { %1198 = vsyncpa [#allocation6], 1 }
 0x14b   :  { %1199 = vsyncpa [#allocation4], 1 }

</bundles_post_ra>
